<compile_context>
chip_gen: v6e
topology: v6e:2x2x1
jax: 0.10.0
libtpu: 0.0.40
codegen_flags: <defaults>
</compile_context>

<pallas_src>
import jax
import jax.numpy as jnp
from jax.experimental import pallas as pl
from jax.experimental.pallas import tpu as pltpu


# ---------------------------------------------------------------------------
# Kernel 1 (prologue): fused L2-normalize + 1/T scale of the query batch.
# ---------------------------------------------------------------------------
def _normalize_scale_kernel(params_ref, x_ref, xs_ref):
    # params_ref: SMEM (2,) float32 -> [T, momentum] (momentum unused in fwd).
    inv_T = 1.0 / params_ref[0]
    x = x_ref[...].astype(jnp.float32)                       # (tile_m, D)
    # F.normalize(x, dim=1, p=2) == x / max(||x||_2, 1e-12).
    # Clamp sq at eps^2 so rsqrt reproduces max(norm, 1e-12); fold 1/T in too.
    sq = jnp.sum(x * x, axis=1, keepdims=True)               # (tile_m, 1)
    scale = jax.lax.rsqrt(jnp.maximum(sq, 1e-24)) * inv_T    # rsqrt -> EUP slot
    xs_ref[...] = (x * scale).astype(xs_ref.dtype)           # bank dtype


# ---------------------------------------------------------------------------
# Kernel 2 (steady state): streaming (tile_m, D) @ (tile_n, D)^T.
# ---------------------------------------------------------------------------
def _stream_matmul_kernel(xs_ref, mem_ref, out_ref):
    # One MXU issue + one lane-dense store per grid step; f32 accumulation.
    out = jax.lax.dot_general(
        xs_ref[...], mem_ref[...],
        dimension_numbers=(((1,), (1,)), ((), ())),
        preferred_element_type=jnp.float32,
    )
    out_ref[...] = out.astype(out_ref.dtype)


# ---------------------------------------------------------------------------
# Wrapper.
# ---------------------------------------------------------------------------
def _round_down(v, m):
    return (v // m) * m


def _round_up(v, m):
    return -(-v // m) * m


def _vmem_budget_bytes():
    """Per-TensorCore VMEM capacity minus headroom (generation-aware)."""
    cap = None
    try:
        cap = int(pltpu.get_tpu_info().vmem_capacity_bytes)
    except Exception:
        cap = None
    if not cap or cap <= 0:
        cap = 64 << 20  # v7x per-TC VMEM: smallest across current generations.
    return cap - (8 << 20)  # leave headroom for Mosaic's own scratch


def _est_vmem(tile_m, tile_n, D, mem_item, out_item):
    return (2 * tile_n * D * mem_item       # streamed bank tiles (double-buffered)
            + 2 * tile_m * D * mem_item     # x_s tiles
            + 2 * tile_m * tile_n * out_item  # output tiles
            + (2 << 20))                    # headroom


def linear_average_forward(x, memory, params, *, block_n=None, block_m=None,
                           out_dtype=jnp.float32):
    """Forward of LinearAverage.

    x: (B, D) float32, memory: (N, D) float32 or bfloat16,
    params: (2,) float32 = [T, momentum]. Returns (B, N) in out_dtype.
    """
    B, D = x.shape
    N, D2 = memory.shape
    assert D == D2
    mem_item = memory.dtype.itemsize
    out_item = jnp.dtype(out_dtype).itemsize

    # ---- batch tile (sublane axis; multiple of 8 unless it spans all of B) --
    if block_m is not None:
        tile_m = min(block_m, B)
    else:
        tile_m = B if B <= 256 else 256
    if tile_m != B:
        tile_m = max(8, _round_down(tile_m, 8))
    grid_b = pl.cdiv(B, tile_m)

    # ---- bank tile (lane-dense output axis; ~2 MiB streamed bank tile) ------
    budget = _vmem_budget_bytes()
    if block_n is not None:
        tile_n = min(block_n, N)
    else:
        tile_n = _round_down((2 << 20) // (D * mem_item), 256)       # ~2 MiB bank tile
        out_cap = _round_down((2 << 20) // max(tile_m * out_item, 1), 256)  # ~2 MiB out tile
        tile_n = max(512, min(tile_n, max(out_cap, 256)))
        if tile_n >= N:
            tile_n = N
            # v7x has 2 TensorCores: give the parallel N axis >= 2 programs
            # when the bank is big enough to be worth splitting.
            if N > 256:
                half = max(256, _round_up((N + 1) // 2, 256))
                if half < N:
                    tile_n = half
        # Shrink if the double-buffered working set would not fit VMEM.
        while (_est_vmem(tile_m, tile_n, D, mem_item, out_item) > budget
               and tile_n > 256):
            tile_n = max(256, _round_down(tile_n // 2, 256))
    grid_n = pl.cdiv(N, tile_n)

    est = _est_vmem(tile_m, tile_n, D, mem_item, out_item)
    vmem_limit = int(min(max(est, 16 << 20), budget))

    # ---- prologue: x_s = normalize(x) / T, cast to the bank dtype -----------
    x_s = pl.pallas_call(
        _normalize_scale_kernel,
        grid=(grid_b,),
        out_shape=jax.ShapeDtypeStruct((B, D), memory.dtype),
        in_specs=[
            pl.BlockSpec(memory_space=pltpu.SMEM),           # params (scalars)
            pl.BlockSpec((tile_m, D), lambda i: (i, 0)),
        ],
        out_specs=pl.BlockSpec((tile_m, D), lambda i: (i, 0)),
        compiler_params=pltpu.CompilerParams(
            dimension_semantics=("parallel",),
        ),
    )(params, x)

    # ---- steady state: stream the bank once, write (tile_m, tile_n) tiles ---
    out = pl.pallas_call(
        _stream_matmul_kernel,
        grid=(grid_n, grid_b),                               # N outermost: single pass over the bank
        out_shape=jax.ShapeDtypeStruct((B, N), out_dtype),
        in_specs=[
            pl.BlockSpec((tile_m, D), lambda j, i: (i, 0)),  # x_s (resident when grid_b == 1)
            pl.BlockSpec((tile_n, D), lambda j, i: (j, 0)),  # bank tile, streamed HBM->VMEM
        ],
        out_specs=pl.BlockSpec((tile_m, tile_n), lambda j, i: (i, j)),
        compiler_params=pltpu.CompilerParams(
            dimension_semantics=("parallel", "parallel"),    # v7x: both TCs get work
            vmem_limit_bytes=vmem_limit,
        ),
    )(x_s, memory)
    return out


def make_linear_average_params(key, input_size, output_size, T=0.05, momentum=0.5,
                               dtype=jnp.float32):
    """Deterministic re-implementation of LinearAverage.__init__ buffers."""
    init = 0.01 * jax.random.normal(key, (output_size, input_size), dtype=jnp.float32)
    init_norm = jnp.sqrt(jnp.sum(init * init, axis=1, keepdims=True))
    memory = (init / init_norm).astype(dtype)
    params = jnp.array([T, momentum], dtype=jnp.float32)
    return memory, params


if __name__ == "__main__":
    # Small shapes consistent with the module: B queries of dim D against a
    # memory bank of N entries.
    B, D, N = 8, 32, 256

    key = jax.random.PRNGKey(0)
    k_mem, k_x = jax.random.split(key)

    memory_f32, params = make_linear_average_params(
        k_mem, input_size=D, output_size=N, T=0.05, momentum=0.5)
    x = jax.random.normal(k_x, (B, D), dtype=jnp.float32)
    # y (labels) only matters for the backward/memory-update pass; forward ignores it.
    y = jnp.arange(B, dtype=jnp.int32)  # noqa: F841
    T = float(params[0])

    # Pure-JAX reference with PyTorch semantics.
    x_n = x / jnp.maximum(jnp.sqrt(jnp.sum(x * x, axis=1, keepdims=True)), 1e-12)
    ref = (x_n @ memory_f32.T) / T

    # ---- f32 bank, explicit small tile (exercises the N-tiling grid) --------
    out_f32 = jax.block_until_ready(
        linear_average_forward(x, memory_f32, params, block_n=128))
    assert out_f32.shape == (B, N)
    assert jnp.allclose(out_f32, ref, atol=1e-3, rtol=1e-3)

    # ---- f32 bank, auto-derived tiles ----------------------------------------
    out_auto = jax.block_until_ready(linear_average_forward(x, memory_f32, params))
    assert out_auto.shape == (B, N)
    assert jnp.allclose(out_auto, ref, atol=1e-3, rtol=1e-3)

    # ---- bf16 bank + bf16 output (halves bank-read and output-write bytes) --
    memory_bf16 = memory_f32.astype(jnp.bfloat16)
    out_bf16 = jax.block_until_ready(
        linear_average_forward(x, memory_bf16, params, out_dtype=jnp.bfloat16))
    assert out_bf16.shape == (B, N)
    assert out_bf16.dtype == jnp.bfloat16
    assert jnp.allclose(out_bf16.astype(jnp.float32), ref, atol=0.3, rtol=0.05)

    print("KERNEL_OK")
</pallas_src>

<mosaic_0001>
module attributes {stable_mosaic.version = 11 : i64} {
  func.func @_normalize_scale_kernel(%arg0: i32, %arg1: memref<2xf32, #tpu.memory_space<smem>>, %arg2: memref<8x32xf32, #tpu.memory_space<vmem>>, %arg3: memref<8x32xf32, #tpu.memory_space<vmem>>) attributes {dimension_semantics = [#tpu.dimension_semantics<parallel>], iteration_bounds = array<i64: 1>, scalar_prefetch = 0 : i64, scratch_operands = 0 : i64, tpu.core_type = #tpu.core_type<tc>, window_params = [{transform_indices = @transform_0, window_bounds = array<i64: 2>}, {transform_indices = @transform_1, window_bounds = array<i64: 8, 32>}, {transform_indices = @transform_2, window_bounds = array<i64: 8, 32>}]} {
    %c0 = arith.constant 0 : index
    %0 = memref.load %arg1[%c0] : memref<2xf32, #tpu.memory_space<smem>>
    %cst = arith.constant 1.000000e+00 : f32
    %1 = arith.divf %cst, %0 : f32
    %c0_0 = arith.constant 0 : index
    %c0_1 = arith.constant 0 : index
    %2 = vector.load %arg2[%c0_0, %c0_1] : memref<8x32xf32, #tpu.memory_space<vmem>>, vector<8x32xf32>
    %3 = arith.mulf %2, %2 : vector<8x32xf32>
    %cst_2 = arith.constant dense<0.000000e+00> : vector<8xf32>
    %4 = vector.multi_reduction <add>, %3, %cst_2 [1] : vector<8x32xf32> to vector<8xf32>
    %5 = vector.shape_cast %4 : vector<8xf32> to vector<8x1xf32>
    %cst_3 = arith.constant 1.000000e-24 : f32
    %6 = vector.broadcast %cst_3 : f32 to vector<8x1xf32>
    %7 = arith.maximumf %5, %6 : vector<8x1xf32>
    %8 = math.rsqrt %7 : vector<8x1xf32>
    %9 = vector.broadcast %1 : f32 to vector<8x1xf32>
    %10 = arith.mulf %8, %9 : vector<8x1xf32>
    %11 = vector.broadcast %10 : vector<8x1xf32> to vector<8x32xf32>
    %12 = arith.mulf %2, %11 : vector<8x32xf32>
    %c0_4 = arith.constant 0 : index
    %c0_5 = arith.constant 0 : index
    %13 = vector.load %arg3[%c0_4, %c0_5] : memref<8x32xf32, #tpu.memory_space<vmem>>, vector<8x32xf32>
    tpu.vector_store %arg3[%c0_4, %c0_5], %12 {strides = array<i32>} : memref<8x32xf32, #tpu.memory_space<vmem>>, vector<8x32xf32>,
    return
  }
  func.func @transform_0(%arg0: i32) -> i32 {
    %c0_i32 = arith.constant 0 : i32
    %c0_i32_0 = arith.constant 0 : i32
    return %c0_i32 : i32
  }
  func.func @transform_1(%arg0: i32) -> (i32, i32) {
    %c0_i32 = arith.constant 0 : i32
    %c0_i32_0 = arith.constant 0 : i32
    return %arg0, %c0_i32 : i32, i32
  }
  func.func @transform_2(%arg0: i32) -> (i32, i32) {
    %c0_i32 = arith.constant 0 : i32
    %c0_i32_0 = arith.constant 0 : i32
    return %arg0, %c0_i32 : i32, i32
  }
}

</mosaic_0001>

<bundles_post_ra>
// kernel: tpu_custom_call.1
= control target key start
LH: loop header
LB: loop body
LE: loop exit
PB: predicated region body
PF: predicated region fallthrough
CT: control target
= control target key end

     0   :  { %7 = vsyncpa [#allocation5], 0  ;;  %s159_s0 = inlined_call_operand.hbm [shape: f32[2], index: 0, kind: input, shape index: {}]   ;;  %s160_s1 = inlined_call_operand.hbm [shape: f32[8,32], index: 1, kind: input, shape index: {}]   ;;  %s161_s2 = inlined_call_operand.hbm [shape: f32[8,32], index: 2, kind: output, shape index: {}]  }
   0x1   :  { %8 = vsyncpa [#allocation3], 0 }
   0x2   :  { %9 = vsyncpa [#allocation4], 0  ;;  %s130_s9 = smov [#allocation2]   ;;  %s131_s12 = smov [#allocation6]  }
   0x3   :  { %17 = dma.hbm_to_smem %s159_s0, 16, %s130_s9, [#allocation5]  }
   0x4   :  { %s24_s13 = sshll.u32 %s131_s12, 4  ;;  %s25_s13 = int_to_ptr.vmem [resolvable:$true] %s24_s13 }
   0x5   :  { %s92_s14 = scalar_lea.vmem %s25_s13, 128  ;;  %p97_p1 = scmp.lt.s32.totalorder %s25_s13, %s25_s13 }
   0x6   :  { %p93_p0 = scmp.ne.s32.totalorder %s25_s13, %s92_s14  ;;  %p98_p2 = scmp.lt.s32.totalorder %s92_s14, %s92_s14 }
   0x8   :  { %p99_p3 = por %p98_p2, %p97_p1 }
   0xa   :  { %p100_p4 = pnand %p99_p3, %p93_p0 }
   0xc   :  { %103 = shalt.err (!%p100_p4)
}
   0xd   :  { %27 = dma.hbm_to_vmem [thread:$0]  %s160_s1, 128, %s25_s13, [#allocation3]  }
   0xe   :  { %124 = dma.done.wait [#allocation5], 16  }
   0xf   :  { %125 = vsyncadd [#allocation5], 4294967280 }
  0x10   :  { %126 = dma.done.wait [#allocation3], 128  }
  0x11   :  { %127 = vsyncadd [#allocation3], 4294967168 }
  0x12   :  { %34 = sfence }
  0x13   :  { %v39_v0 = vld [vmem:[#allocation6] sm:$0xff]  ;;  %vm41_vm0 = vcmask 261120   ;;  %s35_s0 = sld [smem:[#allocation2]]  ;;  %s132_s17 = smov [#allocation7]  }
  0x14   :  { %v40_v1 = vmul.f32 %v39_v0, %v39_v0  ;;  %s57_s18 = sshll.u32 %s132_s17, 4  ;;  %s58_s18 = int_to_ptr.vmem [resolvable:$true] %s57_s18 }
  0x15   :  { %s104_s19 = scalar_lea.vmem %s58_s18, 128  ;;  %p109_p6 = scmp.lt.s32.totalorder %s58_s18, %s58_s18 }
  0x16   :  { %v42_v2 = vsel %vm41_vm0, %v40_v1, 0.0  ;;  %p105_p5 = scmp.ne.s32.totalorder %s58_s18, %s104_s19  ;;  %p110_p7 = scmp.lt.s32.totalorder %s104_s19, %s104_s19 }
  0x17   :  { %43 = vadd.xlane.f32.xlu0 %v42_v2 }
  0x18   :  { %p111_p8 = por %p110_p7, %p109_p6 }
  0x19   :  { %v36_v3 = vstv %s35_s0 }
  0x1a   :  { %72 = vrcp.f32 %v36_v3  ;;  %p112_p9 = pnand %p111_p8, %p105_p5 }
  0x27   :  { %v73_v4 = vpop.eup %72 }
  0x28   :  { %67 = vpush %v73_v4 }
  0x59   :  { %s68_s1 = spop %67 }
  0x5a   :  { %v47_v7 = vstv %s68_s1 }
  0xa0   :  { %v44_v5 = vpop.xlane.xlu0 %43 }
  0xa1   :  { %v45_v6 = vmax.f32 %v44_v5, 1e-24 }
  0xa3   :  { %74 = vrsqrt.f32 %v45_v6 }
  0xb0   :  { %v75_v8 = vpop.eup %74 }
  0xb1   :  { %v48_v9 = vmul.f32 %v75_v8, %v47_v7 }
  0xb3   :  { %v49_v10 = vmul.f32 %v48_v9, %v39_v0 }
  0xb5   :  { %50 = vst.msk [vmem:[#allocation7] sm:$0xff] %vm41_vm0, %v49_v10 }
  0xb6   :  { %115 = shalt.err (!%p112_p9)
}
  0xb7   :  { %60 = dma.vmem_to_hbm [thread:$0]  %s58_s18, 128, %s161_s2, [#allocation4]  }
  0xb8   :  { %128 = dma.done.wait [#allocation4], 128  }
  0xb9   :  { %129 = vsyncadd [#allocation4], 4294967168 }
  0xba   :  { %64 = vsyncpa [#allocation3], 1 }
  0xbb   :  { %65 = vsyncpa [#allocation4], 1 }
  0xbc   :  { %66 = vsyncpa [#allocation5], 1 }

</bundles_post_ra>
